<compile_context>
chip_gen: v7x
topology: tpu7x:2x2x1
jax: 0.10.0
libtpu: 0.0.40
codegen_flags: <defaults>
</compile_context>

<pallas_src>
import functools

import jax
import jax.numpy as jnp
from jax.experimental import pallas as pl
from jax.experimental.pallas import tpu as pltpu

_OUT = 36          # classifier output features
_OUT_PAD = 128     # lane-dense padded output width
_LANE = 128
_NEG = -1e30       # only used by the pure-JAX reference


def _round_up(x, m):
    return (x + m - 1) // m * m


def _gather_classify_kernel(ids_ref, *refs, n_slots, k_per_chan, d_sub):
    """grid = (B,): one graph per step.

    ids_ref   : SMEM scalar-prefetch table (consumed by the index_maps only)
    refs[:n_slots]        : gathered feature rows, each (1, d_sub, 128) bf16
    refs[n_slots]         : classifier weight (4, d_sub, 128, 128) bf16
    refs[n_slots + 1]     : classifier bias   (1, 128) f32
    refs[n_slots + 2]     : output logits     (1, 1, 128) f32
    """
    del ids_ref  # node indices were already applied by the BlockSpec index_maps
    row_refs = refs[:n_slots]
    w_ref = refs[n_slots]
    b_ref = refs[n_slots + 1]
    out_ref = refs[n_slots + 2]

    acc = jnp.zeros((8, _OUT_PAD), jnp.float32)
    slot = 0
    for c in range(4):                      # 0:arga 1:tempa 2:argb 3:tempb
        m = row_refs[slot][0]               # (d_sub, 128) bf16
        slot += 1
        for _ in range(1, k_per_chan[c]):   # max over the channel's node rows
            m = jnp.maximum(m, row_refs[slot][0])
            slot += 1
        # classifier_dropout is identity at inference; fused Linear(4*D, 36):
        # contract the (sublane, lane) feature layout chunk by chunk so no
        # reshape/relayout is ever needed; broadcast to 8 rows for a full
        # MXU sublane tile (result row 0 is the real one).
        for s in range(d_sub):
            lhs = jnp.broadcast_to(m[s:s + 1, :], (8, _LANE))
            acc = acc + jnp.dot(lhs, w_ref[c, s],
                                preferred_element_type=jnp.float32)
    out_ref[0] = acc[0:1, :] + b_ref[...]


def graph_dialogre_forward(node_feats, x_node_id, y_node_id, node_dtype, w, b,
                           *, feat_dtype=jnp.bfloat16, use_core_parallel=False):
    """JAX glue: build the per-graph node-id gather table, pad to lane-dense
    layouts, and run the Pallas gather+classifier kernel.

    node_feats : [B, N, D]   per-node features (output of the graph encoders)
    x_node_id  : [B, Kx]     mention node ids for argument x (per graph)
    y_node_id  : [B, Ky]     mention node ids for argument y (per graph)
    node_dtype : [B, N]      node types; dtype == 4 marks the two "arg" nodes
    w          : [4*D, 36]   classifier weight, in-features first
    b          : [36]        classifier bias
    """
    B, N, D = node_feats.shape
    d_pad = _round_up(max(D, _LANE), _LANE)
    d_sub = d_pad // _LANE

    # ---- cheap scalar prep (XLA): one node id per gather slot ----------------
    def _fix_ids(ids):
        ids = jnp.asarray(ids)
        if ids.ndim == 1:
            ids = ids[:, None]
        # replace sentinel / out-of-range ids with the row's first valid id so
        # the max over the channel is unchanged (reviewer correctness concern).
        valid = (ids >= 0) & (ids < N)
        first = jnp.argmax(valid.astype(jnp.int32), axis=1)
        first_id = jnp.take_along_axis(ids, first[:, None], axis=1)
        return jnp.clip(jnp.where(valid, ids, first_id), 0, N - 1).astype(jnp.int32)

    x_ids = _fix_ids(x_node_id)
    y_ids = _fix_ids(y_node_id)
    is_arg = (node_dtype == 4)
    order = jnp.cumsum(is_arg.astype(jnp.int32), axis=1)
    arg0 = jnp.argmax((is_arg & (order == 1)).astype(jnp.int32), axis=1)
    arg1 = jnp.argmax((is_arg & (order == 2)).astype(jnp.int32), axis=1)
    # TODO(synk): the original indexes arg_feat[1] and would crash with <2
    # dtype==4 nodes; here a missing arg node falls back to node 0.

    # slot layout (channel-major): [x_ids..., arg0, y_ids..., arg1]
    slot_ids = jnp.concatenate(
        [x_ids, arg0[:, None].astype(jnp.int32),
         y_ids, arg1[:, None].astype(jnp.int32)], axis=1)          # [B, KTOT]
    k_per_chan = (x_ids.shape[1], 1, y_ids.shape[1], 1)
    n_slots = slot_ids.shape[1]

    # flat row index into the [B*N, d_sub, 128] feature slab, flattened to 1-D
    # (1-D SMEM avoids the 2-D SMEM padding blowup).
    flat_ids = (jnp.arange(B, dtype=jnp.int32)[:, None] * N
                + slot_ids).reshape(-1).astype(jnp.int32)           # [B*KTOT]

    # ---- feature slab: bf16 transport, lane-dense [B*N, d_sub, 128] ----------
    feats = node_feats.astype(feat_dtype)
    if d_pad != D:
        feats = jnp.pad(feats, ((0, 0), (0, 0), (0, d_pad - D)))
    feats_r = feats.reshape(B * N, d_sub, _LANE)

    # ---- classifier params: bf16 weight [4, d_sub, 128, 128], f32 bias -------
    w4 = w.reshape(4, D, _OUT).astype(feat_dtype)
    w_p = jnp.zeros((4, d_pad, _OUT_PAD), dtype=feat_dtype)
    w_p = w_p.at[:, :D, :_OUT].set(w4).reshape(4, d_sub, _LANE, _OUT_PAD)
    b_p = jnp.zeros((1, _OUT_PAD), jnp.float32).at[0, :_OUT].set(
        b.astype(jnp.float32))

    # ---- Pallas call ----------------------------------------------------------
    kern = functools.partial(_gather_classify_kernel, n_slots=n_slots,
                             k_per_chan=k_per_chan, d_sub=d_sub)

    def _row_spec(k):
        # data-dependent gather: block index along the row axis comes from the
        # scalar-prefetched id table (block size 1 => block index == row index).
        return pl.BlockSpec(
            (1, d_sub, _LANE),
            lambda bidx, ids, k=k: (ids[bidx * n_slots + k], 0, 0))

    in_specs = [_row_spec(k) for k in range(n_slots)]
    in_specs.append(pl.BlockSpec((4, d_sub, _LANE, _OUT_PAD),
                                 lambda bidx, ids: (0, 0, 0, 0)))   # weight (resident)
    in_specs.append(pl.BlockSpec((1, _OUT_PAD),
                                 lambda bidx, ids: (0, 0)))         # bias (resident)
    out_spec = pl.BlockSpec((1, 1, _OUT_PAD), lambda bidx, ids: (bidx, 0, 0))

    dim0 = pltpu.CORE_PARALLEL if use_core_parallel else "parallel"

    cost = pl.CostEstimate(
        flops=2 * B * 4 * d_pad * _OUT_PAD,
        transcendentals=0,
        bytes_accessed=(B * n_slots * d_pad * feats_r.dtype.itemsize
                        + w_p.size * w_p.dtype.itemsize
                        + B * _OUT_PAD * 4
                        + flat_ids.size * 4),
    )

    out = pl.pallas_call(
        kern,
        out_shape=jax.ShapeDtypeStruct((B, 1, _OUT_PAD), jnp.float32),
        grid_spec=pltpu.PrefetchScalarGridSpec(
            num_scalar_prefetch=1,
            grid=(B,),
            in_specs=in_specs,
            out_specs=out_spec,
        ),
        compiler_params=pltpu.CompilerParams(
            dimension_semantics=(dim0,),
        ),
        cost_estimate=cost,
    )(flat_ids, *([feats_r] * n_slots), w_p, b_p)

    return out[:, 0, :_OUT]


def _reference(node_feats, x_node_id, y_node_id, node_dtype, w, b):
    """Pure-JAX reference of the same forward (masked-max formulation)."""
    B, N, D = node_feats.shape
    x_mask = (jax.nn.one_hot(x_node_id, N).sum(1) > 0)[:, :, None]
    y_mask = (jax.nn.one_hot(y_node_id, N).sum(1) > 0)[:, :, None]
    arga = jnp.max(jnp.where(x_mask, node_feats, _NEG), axis=1)
    argb = jnp.max(jnp.where(y_mask, node_feats, _NEG), axis=1)
    is_arg = node_dtype == 4
    order = jnp.cumsum(is_arg.astype(jnp.int32), axis=1)
    am = (is_arg & (order == 1))[:, :, None]
    bm = (is_arg & (order == 2))[:, :, None]
    tempa = jnp.max(jnp.where(am, node_feats, _NEG), axis=1)
    tempb = jnp.max(jnp.where(bm, node_feats, _NEG), axis=1)
    y = jnp.concatenate([arga, tempa, argb, tempb], axis=-1)
    return jnp.dot(y, w, precision=jax.lax.Precision.HIGHEST) + b


if __name__ == "__main__":
    key = jax.random.PRNGKey(0)
    B, N, D = 2, 16, 32   # batch graphs, nodes per graph, embed_dim

    k_feat, k_x, k_y, k_w, k_b = jax.random.split(key, 5)

    # synthetic "post-encoder" node features
    node_feats = jax.random.normal(k_feat, (B, N, D), dtype=jnp.float32)

    # each example selects 2 mention nodes for x and y
    x_node_id = jax.random.randint(k_x, (B, 2), 0, N)
    y_node_id = jax.random.randint(k_y, (B, 2), 0, N)

    # node dtypes: mark exactly two "argument" nodes (dtype == 4) per graph
    node_dtype = jnp.zeros((B, N), dtype=jnp.int32)
    arg_pos = jnp.array([[3, 9], [1, 12]], dtype=jnp.int32)
    node_dtype = node_dtype.at[jnp.arange(B)[:, None], arg_pos].set(4)

    # deterministic classifier params: Linear(4*D, 36), stored in-features first
    w = 0.02 * jax.random.normal(k_w, (4 * D, _OUT), dtype=jnp.float32)
    b = 0.02 * jax.random.normal(k_b, (_OUT,), dtype=jnp.float32)

    out = graph_dialogre_forward(node_feats, x_node_id, y_node_id, node_dtype,
                                 w, b)
    out = jax.block_until_ready(out)

    # reference computed on the same bf16-rounded values the kernel consumes
    feats_bf = node_feats.astype(jnp.bfloat16).astype(jnp.float32)
    w_bf = w.astype(jnp.bfloat16).astype(jnp.float32)
    ref = _reference(feats_bf, x_node_id, y_node_id, node_dtype, w_bf, b)

    assert out.shape == (B, _OUT)
    assert jnp.allclose(out, ref, atol=1e-2, rtol=1e-2), \
        float(jnp.max(jnp.abs(out - ref)))

    print("KERNEL_OK")
</pallas_src>

<mosaic_0001>
module attributes {stable_mosaic.version = 11 : i64} {
  func.func @_gather_classify_kernel(%arg0: i32, %arg1: memref<12xi32, #tpu.memory_space<smem>>, %arg2: memref<1x1x128xbf16, #tpu.memory_space<vmem>>, %arg3: memref<1x1x128xbf16, #tpu.memory_space<vmem>>, %arg4: memref<1x1x128xbf16, #tpu.memory_space<vmem>>, %arg5: memref<1x1x128xbf16, #tpu.memory_space<vmem>>, %arg6: memref<1x1x128xbf16, #tpu.memory_space<vmem>>, %arg7: memref<1x1x128xbf16, #tpu.memory_space<vmem>>, %arg8: memref<4x1x128x128xbf16, #tpu.memory_space<vmem>>, %arg9: memref<1x128xf32, #tpu.memory_space<vmem>>, %arg10: memref<1x1x128xf32, #tpu.memory_space<vmem>>) attributes {dimension_semantics = [#tpu.dimension_semantics<parallel>], iteration_bounds = array<i64: 2>, scalar_prefetch = 1 : i64, scratch_operands = 0 : i64, tpu.core_type = #tpu.core_type<tc>, window_params = [{transform_indices = @transform_0, window_bounds = array<i64: 1, 1, 128>}, {transform_indices = @transform_1, window_bounds = array<i64: 1, 1, 128>}, {transform_indices = @transform_2, window_bounds = array<i64: 1, 1, 128>}, {transform_indices = @transform_3, window_bounds = array<i64: 1, 1, 128>}, {transform_indices = @transform_4, window_bounds = array<i64: 1, 1, 128>}, {transform_indices = @transform_5, window_bounds = array<i64: 1, 1, 128>}, {pipeline_mode = #tpu.pipeline_mode<synchronous>, transform_indices = @transform_6, window_bounds = array<i64: 4, 1, 128, 128>}, {pipeline_mode = #tpu.pipeline_mode<synchronous>, transform_indices = @transform_7, window_bounds = array<i64: 1, 128>}, {transform_indices = @transform_8, window_bounds = array<i64: 1, 1, 128>}]} {
    %cst = arith.constant 0.000000e+00 : f32
    %0 = vector.broadcast %cst : f32 to vector<8x128xf32>
    %c0 = arith.constant 0 : index
    %c0_0 = arith.constant 0 : index
    %c0_1 = arith.constant 0 : index
    %1 = vector.load %arg2[%c0, %c0_0, %c0_1] : memref<1x1x128xbf16, #tpu.memory_space<vmem>>, vector<1x1x128xbf16>
    %2 = vector.shape_cast %1 : vector<1x1x128xbf16> to vector<1x128xbf16>
    %c0_2 = arith.constant 0 : index
    %c0_3 = arith.constant 0 : index
    %c0_4 = arith.constant 0 : index
    %3 = vector.load %arg3[%c0_2, %c0_3, %c0_4] : memref<1x1x128xbf16, #tpu.memory_space<vmem>>, vector<1x1x128xbf16>
    %4 = vector.shape_cast %3 : vector<1x1x128xbf16> to vector<1x128xbf16>
    %5 = arith.maximumf %2, %4 : vector<1x128xbf16>
    %6 = vector.shape_cast %5 : vector<1x128xbf16> to vector<1x128xbf16>
    %7 = vector.broadcast %6 : vector<1x128xbf16> to vector<8x128xbf16>
    %c0_5 = arith.constant 0 : index
    %c0_6 = arith.constant 0 : index
    %c0_7 = arith.constant 0 : index
    %c0_8 = arith.constant 0 : index
    %8 = vector.load %arg8[%c0_5, %c0_6, %c0_7, %c0_8] : memref<4x1x128x128xbf16, #tpu.memory_space<vmem>>, vector<1x1x128x128xbf16>
    %9 = vector.shape_cast %8 : vector<1x1x128x128xbf16> to vector<128x128xbf16>
    %cst_9 = arith.constant dense<0.000000e+00> : vector<8x128xf32>
    %10 = tpu.matmul %7, %9, %cst_9 {dimension_numbers = #tpu.dot_dimension_numbers<[1], [0], [0], [1], [0, 0, 1, 1], [], []>} : vector<8x128xbf16>, vector<128x128xbf16>, vector<8x128xf32> -> vector<8x128xf32>
    %11 = arith.addf %0, %10 : vector<8x128xf32>
    %c0_10 = arith.constant 0 : index
    %c0_11 = arith.constant 0 : index
    %c0_12 = arith.constant 0 : index
    %12 = vector.load %arg4[%c0_10, %c0_11, %c0_12] : memref<1x1x128xbf16, #tpu.memory_space<vmem>>, vector<1x1x128xbf16>
    %13 = vector.shape_cast %12 : vector<1x1x128xbf16> to vector<1x128xbf16>
    %14 = vector.shape_cast %13 : vector<1x128xbf16> to vector<1x128xbf16>
    %15 = vector.broadcast %14 : vector<1x128xbf16> to vector<8x128xbf16>
    %c1 = arith.constant 1 : index
    %c0_13 = arith.constant 0 : index
    %c0_14 = arith.constant 0 : index
    %c0_15 = arith.constant 0 : index
    %16 = vector.load %arg8[%c1, %c0_13, %c0_14, %c0_15] : memref<4x1x128x128xbf16, #tpu.memory_space<vmem>>, vector<1x1x128x128xbf16>
    %17 = vector.shape_cast %16 : vector<1x1x128x128xbf16> to vector<128x128xbf16>
    %cst_16 = arith.constant dense<0.000000e+00> : vector<8x128xf32>
    %18 = tpu.matmul %15, %17, %cst_16 {dimension_numbers = #tpu.dot_dimension_numbers<[1], [0], [0], [1], [0, 0, 1, 1], [], []>} : vector<8x128xbf16>, vector<128x128xbf16>, vector<8x128xf32> -> vector<8x128xf32>
    %19 = arith.addf %11, %18 : vector<8x128xf32>
    %c0_17 = arith.constant 0 : index
    %c0_18 = arith.constant 0 : index
    %c0_19 = arith.constant 0 : index
    %20 = vector.load %arg5[%c0_17, %c0_18, %c0_19] : memref<1x1x128xbf16, #tpu.memory_space<vmem>>, vector<1x1x128xbf16>
    %21 = vector.shape_cast %20 : vector<1x1x128xbf16> to vector<1x128xbf16>
    %c0_20 = arith.constant 0 : index
    %c0_21 = arith.constant 0 : index
    %c0_22 = arith.constant 0 : index
    %22 = vector.load %arg6[%c0_20, %c0_21, %c0_22] : memref<1x1x128xbf16, #tpu.memory_space<vmem>>, vector<1x1x128xbf16>
    %23 = vector.shape_cast %22 : vector<1x1x128xbf16> to vector<1x128xbf16>
    %24 = arith.maximumf %21, %23 : vector<1x128xbf16>
    %25 = vector.shape_cast %24 : vector<1x128xbf16> to vector<1x128xbf16>
    %26 = vector.broadcast %25 : vector<1x128xbf16> to vector<8x128xbf16>
    %c2 = arith.constant 2 : index
    %c0_23 = arith.constant 0 : index
    %c0_24 = arith.constant 0 : index
    %c0_25 = arith.constant 0 : index
    %27 = vector.load %arg8[%c2, %c0_23, %c0_24, %c0_25] : memref<4x1x128x128xbf16, #tpu.memory_space<vmem>>, vector<1x1x128x128xbf16>
    %28 = vector.shape_cast %27 : vector<1x1x128x128xbf16> to vector<128x128xbf16>
    %cst_26 = arith.constant dense<0.000000e+00> : vector<8x128xf32>
    %29 = tpu.matmul %26, %28, %cst_26 {dimension_numbers = #tpu.dot_dimension_numbers<[1], [0], [0], [1], [0, 0, 1, 1], [], []>} : vector<8x128xbf16>, vector<128x128xbf16>, vector<8x128xf32> -> vector<8x128xf32>
    %30 = arith.addf %19, %29 : vector<8x128xf32>
    %c0_27 = arith.constant 0 : index
    %c0_28 = arith.constant 0 : index
    %c0_29 = arith.constant 0 : index
    %31 = vector.load %arg7[%c0_27, %c0_28, %c0_29] : memref<1x1x128xbf16, #tpu.memory_space<vmem>>, vector<1x1x128xbf16>
    %32 = vector.shape_cast %31 : vector<1x1x128xbf16> to vector<1x128xbf16>
    %33 = vector.shape_cast %32 : vector<1x128xbf16> to vector<1x128xbf16>
    %34 = vector.broadcast %33 : vector<1x128xbf16> to vector<8x128xbf16>
    %c3 = arith.constant 3 : index
    %c0_30 = arith.constant 0 : index
    %c0_31 = arith.constant 0 : index
    %c0_32 = arith.constant 0 : index
    %35 = vector.load %arg8[%c3, %c0_30, %c0_31, %c0_32] : memref<4x1x128x128xbf16, #tpu.memory_space<vmem>>, vector<1x1x128x128xbf16>
    %36 = vector.shape_cast %35 : vector<1x1x128x128xbf16> to vector<128x128xbf16>
    %cst_33 = arith.constant dense<0.000000e+00> : vector<8x128xf32>
    %37 = tpu.matmul %34, %36, %cst_33 {dimension_numbers = #tpu.dot_dimension_numbers<[1], [0], [0], [1], [0, 0, 1, 1], [], []>} : vector<8x128xbf16>, vector<128x128xbf16>, vector<8x128xf32> -> vector<8x128xf32>
    %38 = arith.addf %30, %37 : vector<8x128xf32>
    %39 = vector.extract_strided_slice %38 {offsets = [0, 0], sizes = [1, 128], strides = [1, 1]} : vector<8x128xf32> to vector<1x128xf32>
    %c0_34 = arith.constant 0 : index
    %c0_35 = arith.constant 0 : index
    %40 = vector.load %arg9[%c0_34, %c0_35] : memref<1x128xf32, #tpu.memory_space<vmem>>, vector<1x128xf32>
    %41 = arith.addf %39, %40 : vector<1x128xf32>
    %c0_36 = arith.constant 0 : index
    %c0_37 = arith.constant 0 : index
    %c0_38 = arith.constant 0 : index
    %42 = vector.load %arg10[%c0_36, %c0_37, %c0_38] : memref<1x1x128xf32, #tpu.memory_space<vmem>>, vector<1x1x128xf32>
    %43 = vector.shape_cast %42 : vector<1x1x128xf32> to vector<1x128xf32>
    %44 = vector.shape_cast %41 : vector<1x128xf32> to vector<1x1x128xf32>
    tpu.vector_store %arg10[%c0_36, %c0_37, %c0_38], %44 {strides = array<i32>} : memref<1x1x128xf32, #tpu.memory_space<vmem>>, vector<1x1x128xf32>,
    return
  }
  func.func @transform_0(%arg0: i32, %arg1: memref<12xi32, #tpu.memory_space<smem>>) -> (i32, i32, i32) {
    %c6_i32 = arith.constant 6 : i32
    %0 = arith.muli %arg0, %c6_i32 : i32
    %c0_i32 = arith.constant 0 : i32
    %1 = arith.addi %0, %c0_i32 : i32
    %2 = arith.index_cast %1 : i32 to index
    %3 = memref.load %arg1[%2] : memref<12xi32, #tpu.memory_space<smem>>
    %c0_i32_0 = arith.constant 0 : i32
    %c0_i32_1 = arith.constant 0 : i32
    %c0_i32_2 = arith.constant 0 : i32
    return %3, %c0_i32_0, %c0_i32_1 : i32, i32, i32
  }
  func.func @transform_1(%arg0: i32, %arg1: memref<12xi32, #tpu.memory_space<smem>>) -> (i32, i32, i32) {
    %c6_i32 = arith.constant 6 : i32
    %0 = arith.muli %arg0, %c6_i32 : i32
    %c1_i32 = arith.constant 1 : i32
    %1 = arith.addi %0, %c1_i32 : i32
    %2 = arith.index_cast %1 : i32 to index
    %3 = memref.load %arg1[%2] : memref<12xi32, #tpu.memory_space<smem>>
    %c0_i32 = arith.constant 0 : i32
    %c0_i32_0 = arith.constant 0 : i32
    %c0_i32_1 = arith.constant 0 : i32
    return %3, %c0_i32, %c0_i32_0 : i32, i32, i32
  }
  func.func @transform_2(%arg0: i32, %arg1: memref<12xi32, #tpu.memory_space<smem>>) -> (i32, i32, i32) {
    %c6_i32 = arith.constant 6 : i32
    %0 = arith.muli %arg0, %c6_i32 : i32
    %c2_i32 = arith.constant 2 : i32
    %1 = arith.addi %0, %c2_i32 : i32
    %2 = arith.index_cast %1 : i32 to index
    %3 = memref.load %arg1[%2] : memref<12xi32, #tpu.memory_space<smem>>
    %c0_i32 = arith.constant 0 : i32
    %c0_i32_0 = arith.constant 0 : i32
    %c0_i32_1 = arith.constant 0 : i32
    return %3, %c0_i32, %c0_i32_0 : i32, i32, i32
  }
  func.func @transform_3(%arg0: i32, %arg1: memref<12xi32, #tpu.memory_space<smem>>) -> (i32, i32, i32) {
    %c6_i32 = arith.constant 6 : i32
    %0 = arith.muli %arg0, %c6_i32 : i32
    %c3_i32 = arith.constant 3 : i32
    %1 = arith.addi %0, %c3_i32 : i32
    %2 = arith.index_cast %1 : i32 to index
    %3 = memref.load %arg1[%2] : memref<12xi32, #tpu.memory_space<smem>>
    %c0_i32 = arith.constant 0 : i32
    %c0_i32_0 = arith.constant 0 : i32
    %c0_i32_1 = arith.constant 0 : i32
    return %3, %c0_i32, %c0_i32_0 : i32, i32, i32
  }
  func.func @transform_4(%arg0: i32, %arg1: memref<12xi32, #tpu.memory_space<smem>>) -> (i32, i32, i32) {
    %c6_i32 = arith.constant 6 : i32
    %0 = arith.muli %arg0, %c6_i32 : i32
    %c4_i32 = arith.constant 4 : i32
    %1 = arith.addi %0, %c4_i32 : i32
    %2 = arith.index_cast %1 : i32 to index
    %3 = memref.load %arg1[%2] : memref<12xi32, #tpu.memory_space<smem>>
    %c0_i32 = arith.constant 0 : i32
    %c0_i32_0 = arith.constant 0 : i32
    %c0_i32_1 = arith.constant 0 : i32
    return %3, %c0_i32, %c0_i32_0 : i32, i32, i32
  }
  func.func @transform_5(%arg0: i32, %arg1: memref<12xi32, #tpu.memory_space<smem>>) -> (i32, i32, i32) {
    %c6_i32 = arith.constant 6 : i32
    %0 = arith.muli %arg0, %c6_i32 : i32
    %c5_i32 = arith.constant 5 : i32
    %1 = arith.addi %0, %c5_i32 : i32
    %2 = arith.index_cast %1 : i32 to index
    %3 = memref.load %arg1[%2] : memref<12xi32, #tpu.memory_space<smem>>
    %c0_i32 = arith.constant 0 : i32
    %c0_i32_0 = arith.constant 0 : i32
    %c0_i32_1 = arith.constant 0 : i32
    return %3, %c0_i32, %c0_i32_0 : i32, i32, i32
  }
  func.func @transform_6(%arg0: i32, %arg1: memref<12xi32, #tpu.memory_space<smem>>) -> (i32, i32, i32, i32) {
    %c0_i32 = arith.constant 0 : i32
    %c0_i32_0 = arith.constant 0 : i32
    %c0_i32_1 = arith.constant 0 : i32
    %c0_i32_2 = arith.constant 0 : i32
    %c0_i32_3 = arith.constant 0 : i32
    return %c0_i32, %c0_i32_0, %c0_i32_1, %c0_i32_2 : i32, i32, i32, i32
  }
  func.func @transform_7(%arg0: i32, %arg1: memref<12xi32, #tpu.memory_space<smem>>) -> (i32, i32) {
    %c0_i32 = arith.constant 0 : i32
    %c0_i32_0 = arith.constant 0 : i32
    %c0_i32_1 = arith.constant 0 : i32
    return %c0_i32, %c0_i32_0 : i32, i32
  }
  func.func @transform_8(%arg0: i32, %arg1: memref<12xi32, #tpu.memory_space<smem>>) -> (i32, i32, i32) {
    %c0_i32 = arith.constant 0 : i32
    %c0_i32_0 = arith.constant 0 : i32
    %c0_i32_1 = arith.constant 0 : i32
    return %arg0, %c0_i32, %c0_i32_0 : i32, i32, i32
  }
}

</mosaic_0001>

<bundles_post_ra>
// kernel: tpu_custom_call.1
= control target key start
LH: loop header
LB: loop body
LE: loop exit
PB: predicated region body
PF: predicated region fallthrough
CT: control target
= control target key end

     0   :  { %s1743_s0 = inlined_call_operand.vmem [shape: s32[12], index: 0, kind: input, shape index: {}]   ;;  %s1744_s1 = inlined_call_operand.vmem [shape: bf16[32,1,128], index: 1, kind: input, shape index: {}]   ;;  %s1745_s2 = inlined_call_operand.vmem [shape: bf16[32,1,128], index: 2, kind: input, shape index: {}]   ;;  %s1746_s3 = inlined_call_operand.vmem [shape: bf16[32,1,128], index: 3, kind: input, shape index: {}]   ;;  %s1747_s4 = inlined_call_operand.vmem [shape: bf16[32,1,128], index: 4, kind: input, shape index: {}]   ;;  %s1748_s5 = inlined_call_operand.vmem [shape: bf16[32,1,128], index: 5, kind: input, shape index: {}]   ;;  %s1749_s6 = inlined_call_operand.vmem [shape: bf16[32,1,128], index: 6, kind: input, shape index: {}]   ;;  %s1750_s7 = inlined_call_operand.vmem [shape: bf16[4,1,128,128], index: 7, kind: input, shape index: {}]   ;;  %s1751_s8 = inlined_call_operand.vmem [shape: f32[1,128], index: 8, kind: input, shape index: {}]   ;;  %s1752_s9 = inlined_call_operand.hbm [shape: f32[2,1,128], index: 9, kind: output, shape index: {}]  }
   0x1   :  { %s14_s11 = sshll.u32 %s1743_s0, 4  ;;  %s15_s11 = int_to_ptr.vmem [resolvable:$true] %s14_s11 }
   0x2   :  { %s1341_s12 = scalar_lea.vmem %s15_s11, 16  ;;  %p1346_p1 = scmp.lt.s32.totalorder %s15_s11, %s15_s11 }
   0x3   :  { %p1342_p0 = scmp.ne.s32.totalorder %s15_s11, %s1341_s12  ;;  %p1347_p2 = scmp.lt.s32.totalorder %s1341_s12, %s1341_s12 }
   0x5   :  { %p1348_p3 = por %p1347_p2, %p1346_p1 }
   0x7   :  { %p1349_p4 = pnand %p1348_p3, %p1342_p0 }
   0x9   :  { %1352 = shalt.err (!%p1349_p4)  }
   0xa   :  { %s1419_s13 = smov [#allocation3]  }
   0xb   :  { %17 = dma.vmem_to_smem %s15_s11, 16, %s1419_s13, [#allocation2] }
   0xc   :  { %1397 = dma.done.wait [#allocation2], 16 }
   0xd   :  { %1398 = vsyncadd [#allocation2], 4294967280 }
   0xe   :  { %19 = sfence }
   0xf   :  { %20 = vsyncpa [#allocation5], 0 }
  0x10   :  { %22 = vsyncpa [#allocation5 + $0x1], 0  ;;  %s1476_s14 = smov 0   ;;  %s1478_s15 = smov 0  }
  0x11   :  { %s1480_s0 = smov 0   ;;  %s1482_s16 = smov 0  }
  0x12 LB: > { %1754 = sst [smem:[#allocation8_spill]] %s1413_s0  ;;  %s1497_s17 = sadd.s32 4294967295, %s1417_s16   ;;  %s1417_s16 = sphi %s1482_s16, %s1762_s16   ;;  %s1413_s0 = sphi %s1480_s0, %s1759_s0   ;;  %s1409_s15 = sphi %s1478_s15, %s1761_s15   ;;  %s1405_s14 = sphi %s1476_s14, %s1760_s14  }
  0x13   : > { %s1064_s18 = sadd.s32 4294967294, %s1417_s16   ;;  %s1501_s19 = sadd.s32 1, %s1417_s16  }
  0x14   : > { %s267_s20 = sadd.s32 1, %s1413_s0  ;;  %s264_s21 = ssub.s32 %s1417_s16, %s1501_s19 }
  0x15   : > { %p277_p5 = scmp.ne.s32.totalorder %s1413_s0, %s1409_s15  ;;  %p265_p6 = scmp.eq.s32.totalorder %s264_s21, 0 }
  0x16   : > { %p278_p7 = scmp.eq.s32.totalorder %s1497_s17, 1  ;;  %p283_p8 = scmp.ne.s32.totalorder %s1409_s15, %s1405_s14 }
  0x17   : > { %p284_p9 = scmp.eq.s32.totalorder %s1064_s18, 1  ;;  %p1067_p12 = scmp.ge.s32.totalorder %s1417_s16, 1 }
  0x18   : > { %s1512_s22 = scalar_select %p265_p6, %s1413_s0, %s267_s20  }
  0x19   : > { %p1514_p10 = por %p278_p7, %p277_p5  ;;  %p1518_p11 = por %p284_p9, %p283_p8 }
  0x1a   : > { %1755 = sst [smem:[#allocation9_spill]] %s1512_s22  ;;  %p378_p13 = scmp.lt.s32.totalorder %s1417_s16, 3 }
  0x1c   : > { %p379_p0 = pnand %p1067_p12, %p378_p13 }
  0x1d   : > { %v1309_v0 = vld [vmem:[%s1750_s7 + $0x40] sm:$0xff] (!%p379_p0)   ;;  %v1420_v1 = vmov (!%p379_p0), 0.0   ;;  %v1311_v3 = vld [vmem:[%s1750_s7 + $0x48] sm:$0xff] (!%p379_p0)   ;;  %vm1421_vm0 = vmmov (!%p379_p0), 0   ;;  %s1538_s10 = smul.u32 (!%p379_p0), 6, %s1497_s17  ;;  %v1313_v5 = vld [vmem:[%s1750_s7 + $0x50] sm:$0xff] (!%p379_p0)   ;;  %v500_v12 = vlaneseq (!%p379_p0) }
  0x1e   : > { %382 = sbr.rel (%p379_p0) target bundleno = 326 (0x146), region = 52  ;;  %1187 = vmatprep.subr.bf16.mxu0 (!%p379_p0), %v1420_v1  ;;  %1207 = vmatprep.subr.bf16.mxu1 (!%p379_p0), %v1420_v1  ;;  %v1310_v2 = vld [vmem:[%s1750_s7] sm:$0xff] (!%p379_p0)   ;;  %v1312_v4 = vld [vmem:[%s1750_s7 + $0x8] sm:$0xff] (!%p379_p0)   ;;  %v1314_v6 = vld [vmem:[%s1750_s7 + $0x10] sm:$0xff] (!%p379_p0)  }
  0x1f   : > { %1188 = vmatpush3.bf16.msra.mxu0 (!%p379_p0), %v1309_v0  ;;  %1203 = vmatprep.mubr.msk.bf16.mxu0 (!%p379_p0), %vm1421_vm0, %v1420_v1  ;;  %s458_s13 = sadd.s32 (!%p379_p0), 2, %s1538_s10  ;;  %s442_s27 = sld [smem:[#allocation3 + %s1538_s10]] (!%p379_p0)  ;;  %v1315_v7 = vld [vmem:[%s1750_s7 + $0x58] sm:$0xff] (!%p379_p0)   ;;  %v1317_v9 = vld [vmem:[%s1750_s7 + $0x60] sm:$0xff] (!%p379_p0)   ;;  %v1319_v11 = vld [vmem:[%s1750_s7 + $0x68] sm:$0xff] (!%p379_p0)   ;;  %v501_v17 = vshrl.u32 (!%p379_p0), %v500_v12, 7 }
  0x20   : > { %1208 = vmatpush3.bf16.msra.mxu1 (!%p379_p0), %v1310_v2  ;;  %1189 = vmatprep.subr.bf16.mxu0 (!%p379_p0), %v1420_v1  ;;  %s459_s18 = sld [smem:[#allocation3 + %s458_s13]] (!%p379_p0)  ;;  %s449_s28 = sadd.s32 (!%p379_p0), 1, %s1538_s10  ;;  %v1316_v8 = vld [vmem:[%s1750_s7 + $0x18] sm:$0xff] (!%p379_p0)   ;;  %v1318_v10 = vld [vmem:[%s1750_s7 + $0x20] sm:$0xff] (!%p379_p0)   ;;  %v1320_v13 = vld [vmem:[%s1750_s7 + $0x28] sm:$0xff] (!%p379_p0)  }
  0x21   : > { %1209 = vmatprep.subr.bf16.mxu1 (!%p379_p0), %v1420_v1  ;;  %1223 = vmatprep.mubr.msk.bf16.mxu1 (!%p379_p0), %vm1421_vm0, %v1420_v1  ;;  %s450_s29 = sld [smem:[#allocation3 + %s449_s28]] (!%p379_p0)  ;;  %v1321_v16 = vld [vmem:[%s1750_s7 + $0x70] sm:$0xff] (!%p379_p0)   ;;  %v1599_v21 = vsub.s32 (!%p379_p0), 0, %v501_v17  ;;  %v1323_v23 = vld [vmem:[%s1750_s7 + $0x78] sm:$0xff] (!%p379_p0)   ;;  %s467_s20 = sadd.s32 (!%p379_p0), 3, %s1538_s10  ;;  %v1325_v28 = vld [vmem:[%s1750_s7 + $0x80] sm:$0xff] (!%p379_p0)  }
  0x22   : > { %v1322_v20 = vld [vmem:[%s1750_s7 + $0x30] sm:$0xff] (!%p379_p0)   ;;  %v1324_v25 = vld [vmem:[%s1750_s7 + $0x38] sm:$0xff] (!%p379_p0)   ;;  %s476_s21 = sadd.s32 (!%p379_p0), 4, %s1538_s10  ;;  %s468_s28 = sld [smem:[#allocation3 + %s467_s20]] (!%p379_p0)  ;;  %v1326_v29 = vld [vmem:[%s1750_s7 + $0xc0] sm:$0xff] (!%p379_p0)  }
  0x23   : > { %1190 = vmatpush3.bf16.msra.mxu0 (!%p379_p0), %v1311_v3  ;;  %s477_s11 = sld [smem:[#allocation3 + %s476_s21]] (!%p379_p0)  ;;  %v1327_v30 = vld [vmem:[%s1750_s7 + $0x88] sm:$0xff] (!%p379_p0)   ;;  %v1329_v32 = vld [vmem:[%s1750_s7 + $0x90] sm:$0xff] (!%p379_p0)   ;;  %v1331_v34 = vld [vmem:[%s1750_s7 + $0x98] sm:$0xff] (!%p379_p0)  }
  0x24   : > { %1210 = vmatpush3.bf16.msra.mxu1 (!%p379_p0), %v1312_v4  ;;  %1191 = vmatprep.subr.bf16.mxu0 (!%p379_p0), %v1420_v1  ;;  %v1328_v31 = vld [vmem:[%s1750_s7 + $0xc8] sm:$0xff] (!%p379_p0)   ;;  %v1330_v33 = vld [vmem:[%s1750_s7 + $0xd0] sm:$0xff] (!%p379_p0)   ;;  %v1332_v35 = vld [vmem:[%s1750_s7 + $0xd8] sm:$0xff] (!%p379_p0)  }
  0x25   : > { %1211 = vmatprep.subr.bf16.mxu1 %v1420_v1  ;;  %p443_p2 = scmp.lt.s32.totalorder %s442_s27, 31  ;;  %v1333_v36 = vld [vmem:[%s1750_s7 + $0xa0] sm:$0xff]   ;;  %v1335_v38 = vld [vmem:[%s1750_s7 + $0xa8] sm:$0xff]   ;;  %v1337_v43 = vld [vmem:[%s1750_s7 + $0xb0] sm:$0xff]  }
  0x26   : > { %p460_p1 = scmp.lt.s32.totalorder %s459_s18, 31  ;;  %v1334_v37 = vld [vmem:[%s1750_s7 + $0xe0] sm:$0xff]   ;;  %v1336_v41 = vld [vmem:[%s1750_s7 + $0xe8] sm:$0xff]   ;;  %v1338_v44 = vld [vmem:[%s1750_s7 + $0xf0] sm:$0xff]  }
  0x27   : > { %1192 = vmatpush3.bf16.msra.mxu0 %v1313_v5  ;;  %p451_p3 = scmp.lt.s32.totalorder %s450_s29, 31  ;;  %s1766_s27 = smov (!%p443_p2, %s442_s27), 31  ;;  %v1339_v47 = vld [vmem:[%s1750_s7 + $0xb8] sm:$0xff]  }
  0x28   : > { %1212 = vmatpush3.bf16.msra.mxu1 %v1314_v6  ;;  %1193 = vmatprep.subr.bf16.mxu0 %v1420_v1  ;;  %s1764_s18 = smov (!%p460_p1, %s459_s18), 31  ;;  %s445_s13 = scalar_lea.vmem %s1744_s1, %s1766_s27  ;;  %v1340_v49 = vld [vmem:[%s1750_s7 + $0xf8] sm:$0xff]  }
  0x29   : > { %1213 = vmatprep.subr.bf16.mxu1 %v1420_v1  ;;  %s1768_s29 = smov (!%p451_p3, %s450_s29), 31  ;;  %s462_s22 = scalar_lea.vmem %s1746_s3, %s1764_s18  ;;  %v494_v14 = vld [vmem:[%s445_s13] sm:$0x1] }
  0x2a   : > { %s453_s0 = scalar_lea.vmem %s1745_s2, %s1768_s29  ;;  %v520_v18 = vld [vmem:[%s462_s22] sm:$0x1]  ;;  %s485_s18 = sadd.s32 5, %s1538_s10 }
  0x2b   : > { %1194 = vmatpush3.bf16.msra.mxu0 %v1315_v7  ;;  %v495_v15 = vld [vmem:[%s453_s0] sm:$0x1]  ;;  %v522_v22 = vpack.i.b16 %v520_v18, %v520_v18  ;;  %s486_s13 = sld [smem:[#allocation3 + %s485_s18]]  ;;  %p469_p4 = scmp.lt.s32.totalorder %s468_s28, 31 }
  0x2c   : > { %1214 = vmatpush3.bf16.msra.mxu1 %v1316_v8  ;;  %1195 = vmatprep.subr.bf16.mxu0 %v1420_v1  ;;  %v496_v19 = vmax.bf16 %v495_v15, %v494_v14  ;;  %p478_p5 = scmp.lt.s32.totalorder %s477_s11, 31  ;;  %s439_s27 = sand.u32 1, %s1409_s15  }
  0x2d   : > { %1215 = vmatprep.subr.bf16.mxu1 %v1420_v1  ;;  %v527_v26 = vrot.slane %v522_v22, %v1599_v21  ;;  %s1770_s28 = smov (!%p469_p4, %s468_s28), 31  ;;  %s1148_s0 = sshll.u32 %s1497_s17, 4 }
  0x2e   : > { %v498_v24 = vpack.i.b16 %v496_v19, %v496_v19  ;;  %s1772_s11 = smov (!%p478_p5, %s477_s11), 31  ;;  %s471_s21 = scalar_lea.vmem %s1747_s4, %s1770_s28 }
  0x2f   : > { %1196 = vmatpush3.bf16.msra.mxu0 %v1317_v9  ;;  %s480_s30 = scalar_lea.vmem %s1748_s5, %s1772_s11  ;;  %v721_v39 = vld [vmem:[%s471_s21] sm:$0x1]  ;;  %s440_s28 = scalar_lea.vmem [#allocation4], %s439_s27 }
  0x30   : > { %1216 = vmatpush3.bf16.msra.mxu1 %v1318_v10  ;;  %1197 = vmatprep.subr.bf16.mxu0 %v1420_v1  ;;  %v503_v27 = vrot.slane %v498_v24, %v1599_v21  ;;  %v722_v40 = vld [vmem:[%s480_s30] sm:$0x1]  ;;  %s967_s11 = sshll.u32 %s440_s28, 4  ;;  %s1701_s10 = scalar_lea.hbm %s1752_s9, %s1148_s0  ;;  %s1703_s11 = int_to_ptr.vmem [resolvable:$true] %s967_s11 }
  0x31   : > { %1217 = vmatprep.subr.bf16.mxu1 %v1420_v1  ;;  %p487_p6 = scmp.lt.s32.totalorder %s486_s13, 31  ;;  %v723_v42 = vmax.bf16 %v722_v40, %v721_v39  ;;  %s955_s20 = scalar_lea.sflag [#allocation5], %s439_s27 }
  0x32   : > { %s1353_s17 = scalar_lea.vmem %s1703_s11, 16  ;;  %s1422_s21 = smov [#allocation4]  }
  0x33   : > { %1198 = vmatpush3.bf16.msra.mxu0 %v1319_v11  ;;  %s1774_s13 = smov (!%p487_p6, %s486_s13), 31  ;;  %v725_v46 = vpack.i.b16 %v723_v42, %v723_v42  ;;  %p1354_p7 = scmp.ne.s32.totalorder %s1703_s11, %s1353_s17 }
  0x34   : > { %1218 = vmatpush3.bf16.msra.mxu1 %v1320_v13  ;;  %1199 = vmatprep.subr.bf16.mxu0 %v1420_v1  ;;  %s489_s29 = scalar_lea.vmem %s1749_s6, %s1774_s13  ;;  %s1357_s25 = sshll.u32 %s1422_s21, 4  ;;  %s1358_s25 = int_to_ptr.vmem [resolvable:$false] %s1357_s25 }
  0x35   : > { %1219 = vmatprep.subr.bf16.mxu1 %v1420_v1  ;;  %v837_v45 = vld [vmem:[%s489_s29] sm:$0x1]  ;;  %v730_v50 = vrot.slane %v725_v46, %v1599_v21  ;;  %p1355_p8 = pnand %p1354_p7, %p1514_p10  ;;  %s1359_s13 = scalar_lea.vmem %s1358_s25, 32 }
  0x36   : > { %v839_v48 = vpack.i.b16 %v837_v45, %v837_v45  ;;  %p1360_p12 = scmp.lt.s32.totalorder %s1703_s11, %s1358_s25  ;;  %p1361_p13 = scmp.lt.s32.totalorder %s1359_s13, %s1353_s17 }
  0x37   : > { %1200 = vmatpush3.bf16.msra.mxu0 %v1321_v16  ;;  %p1356_p9 = pneg %p1355_p8 }
  0x38   : > { %1220 = vmatpush3.bf16.msra.mxu1 %v1322_v20  ;;  %1201 = vmatprep.subr.bf16.mxu0 %v1420_v1  ;;  %v844_v51 = vrot.slane %v839_v48, %v1599_v21  ;;  %p1362_p0 = por %p1361_p13, %p1360_p12 }
  0x39   : > { %1221 = vmatprep.subr.bf16.mxu1 %v1420_v1 }
  0x3a   : > { %p1363_p1 = pnand %p1362_p0, %p1356_p9 }
  0x3b   : > { %1202 = vmatpush3.bf16.msra.mxu0 %v1323_v23 }
  0x3c   : > { %1222 = vmatpush3.bf16.msra.mxu1 %v1324_v25  ;;  %1227 = vmatprep.subr.bf16.mxu0 %v1420_v1 }
  0x3d   : > { %1247 = vmatprep.subr.bf16.mxu1 %v1420_v1 }
  0x3e   : > { %1204 = vmatmul.mubr.bf16.vlgmr.msra.gmra.mrb[0].mxu0 %v527_v26 }
  0x3f   : > { %1224 = vmatmul.mubr.bf16.vlgmr.msra.gmra.mrb[0].mxu1 %v503_v27  ;;  %1228 = vmatpush3.bf16.msra.mxu0 %v1325_v28 }
  0x40   : > { %1248 = vmatpush3.bf16.msra.mxu1 %v1326_v29  ;;  %1229 = vmatprep.subr.bf16.mxu0 %v1420_v1 }
  0x41   : > { %1249 = vmatprep.subr.bf16.mxu1 %v1420_v1  ;;  %1243 = vmatprep.mubr.msk.bf16.mxu0 %vm1421_vm0, %v1420_v1 }
  0x42   : > { %1263 = vmatprep.mubr.msk.bf16.mxu1 %vm1421_vm0, %v1420_v1 }
  0x43   : > { %1230 = vmatpush3.bf16.msra.mxu0 %v1327_v30 }
  0x44   : > { %1250 = vmatpush3.bf16.msra.mxu1 %v1328_v31  ;;  %1231 = vmatprep.subr.bf16.mxu0 %v1420_v1 }
  0x45   : > { %1251 = vmatprep.subr.bf16.mxu1 %v1420_v1 }
  0x47   : > { %1232 = vmatpush3.bf16.msra.mxu0 %v1329_v32 }
  0x48   : > { %1252 = vmatpush3.bf16.msra.mxu1 %v1330_v33  ;;  %1233 = vmatprep.subr.bf16.mxu0 %v1420_v1 }
  0x49   : > { %1253 = vmatprep.subr.bf16.mxu1 %v1420_v1 }
  0x4b   : > { %1234 = vmatpush3.bf16.msra.mxu0 %v1331_v34 }
  0x4c   : > { %1254 = vmatpush3.bf16.msra.mxu1 %v1332_v35  ;;  %1235 = vmatprep.subr.bf16.mxu0 %v1420_v1 }
  0x4d   : > { %1255 = vmatprep.subr.bf16.mxu1 %v1420_v1 }
  0x4f   : > { %1236 = vmatpush3.bf16.msra.mxu0 %v1333_v36 }
  0x50   : > { %1256 = vmatpush3.bf16.msra.mxu1 %v1334_v37  ;;  %1237 = vmatprep.subr.bf16.mxu0 %v1420_v1 }
  0x51   : > { %1257 = vmatprep.subr.bf16.mxu1 %v1420_v1 }
  0x53   : > { %1238 = vmatpush3.bf16.msra.mxu0 %v1335_v38 }
  0x54   : > { %1258 = vmatpush3.bf16.msra.mxu1 %v1336_v41  ;;  %1239 = vmatprep.subr.bf16.mxu0 %v1420_v1 }
  0x55   : > { %1259 = vmatprep.subr.bf16.mxu1 %v1420_v1 }
  0x57   : > { %1240 = vmatpush3.bf16.msra.mxu0 %v1337_v43 }
  0x58   : > { %1260 = vmatpush3.bf16.msra.mxu1 %v1338_v44  ;;  %1241 = vmatprep.subr.bf16.mxu0 %v1420_v1 }
  0x59   : > { %1261 = vmatprep.subr.bf16.mxu1 %v1420_v1  ;;  %v951_v1 = vld [vmem:[%s1751_s8] sm:$0x1] }
  0x5b   : > { %1242 = vmatpush3.bf16.msra.mxu0 %v1339_v47 }
  0x5c   : > { %1262 = vmatpush3.bf16.msra.mxu1 %v1340_v49 }
  0x5e   : > { %1244 = vmatmul.mubr.bf16.vlgmr.msra.gmra.mrb[4].mxu0 %v730_v50 }
  0x5f   : > { %1264 = vmatmul.mubr.bf16.vlgmr.msra.gmra.mrb[4].mxu1 %v844_v51 }
 0x111   : > { %v627_v52 = vpop.f32.mrb[0].mxu0 }
 0x112   : > { %v715_v53 = vpop.f32.mrb[0].mxu1  ;;  %v1205_v54 = vpop.f32.mrb[1].mxu0 }
 0x113   : > { %v716_v55 = vadd.f32 %v715_v53, %v627_v52  ;;  %v1225_v56 = vpop.f32.mrb[1].mxu1  ;;  %v630_v57 = vpop.f32.mrb[2].mxu0 }
 0x114   : > { %v718_v58 = vpop.f32.mrb[2].mxu1  ;;  %v1206_v59 = vpop.f32.mrb[3].mxu0 }
 0x115   : > { %v1226_v60 = vpop.f32.mrb[3].mxu1 }
 0x131   : > { %v830_v61 = vpop.f32.mrb[4].mxu0 }
 0x132   : > { %v836_v62 = vadd.f32 %v830_v61, %v716_v55  ;;  %v944_v63 = vpop.f32.mrb[4].mxu1  ;;  %v1245_v0 = vpop.f32.mrb[5].mxu0 }
 0x133   : > { %v1265_v2 = vpop.f32.mrb[5].mxu1  ;;  %v833_v3 = vpop.f32.mrb[6].mxu0 }
 0x134   : > { %v950_v4 = vadd.f32 %v944_v63, %v836_v62  ;;  %v947_v5 = vpop.f32.mrb[6].mxu1  ;;  %v1246_v6 = vpop.f32.mrb[7].mxu0 }
 0x135   : > { %v1266_v7 = vpop.f32.mrb[7].mxu1 }
 0x136   : > { %v952_v8 = vadd.f32 %v951_v1, %v950_v4 }
 0x138   : > { %953 = vst [vmem:[%s440_s28] sm:$0x1] %v952_v8 }
 0x139   : > { %1366 = shalt.err (!%p1363_p1)
}
 0x13a   : > { %s1367_s26 = scalar_lea.hbm %s1701_s10, 16  ;;  %s1371_s18 = scalar_lea.hbm %s1752_s9, 32 }
 0x13b   : > { %p1368_p2 = scmp.ne.s32.totalorder %s1701_s10, %s1367_s26  ;;  %p1372_p5 = scmp.lt.u32.totalorder %s1701_s10, %s1752_s9 }
 0x13c   : > { %p1373_p6 = scmp.lt.u32.totalorder %s1371_s18, %s1367_s26  ;;  %p1375_p8 = scmp.lt.u32.totalorder %s1367_s26, %s1701_s10 }
 0x13d   : > { %p1369_p3 = pnand %p1368_p2, %p1514_p10 }
 0x13e   : > { %p1374_p7 = por %p1373_p6, %p1372_p5 }
 0x13f   : > { %p1370_p4 = pneg %p1369_p3 }
 0x140   : > { %p1376_p9 = por %p1375_p8, %p1374_p7 }
 0x142   : > { %p1377_p12 = pnand %p1376_p9, %p1370_p4 }
 0x144   : > { %1380 = shalt.err (!%p1377_p12)
}
 0x145   : > { %1267 = dma.vmem_to_hbm [thread:$0]  (%p1514_p10), %s1703_s11, 16, %s1701_s10, %s955_s20  }
 0x146 PF: > { %p1273_p13 = scmp.ge.s32.totalorder %s1417_s16, 2  ;;  %s979_s28 = sand.u32 1, %s1405_s14  }
 0x147   : > { %s980_s29 = scalar_lea.sflag [#allocation5], %s979_s28 }
 0x148   : > { %p1270_p0 = pnand %p1273_p13, %p1518_p11 }
 0x14a   : > { %1400 = dma.done.wait (!%p1270_p0), %s980_s29, 16  }
 0x14b   : > { %1402 = vsyncadd (!%p1270_p0), %s980_s29, 4294967280  ;;  %s1758_s22 = sld [smem:[#allocation8_spill]]  ;;  %s1759_s0 = sld [smem:[#allocation9_spill]] }
 0x14c   : > { %p25_p1 = scmp.ge.s32.totalorder %s1501_s19, 4   ;;  %s1760_s14 = smov %s1409_s15 }
 0x14d   : > { %s1762_s16 = smov %s1501_s19 }
 0x14e   :  { %27 = sbr.rel (!%p25_p1) target bundleno = 18 (0x12), region = 105 }
 0x151   : > { %s1761_s15 = smov %s1758_s22 }
 0x155   :  { %984 = vsyncpa [#allocation5], 1 }
 0x156   :  { %986 = vsyncpa [#allocation5 + $0x1], 1 }

</bundles_post_ra>
